<compile_context>
chip_gen: v7x
topology: tpu7x:2x2x1
jax: 0.10.0
libtpu: 0.0.40
codegen_flags: <defaults>
</compile_context>

<pallas_src>
import functools

import jax
import jax.numpy as jnp
from jax import lax
from jax.experimental import pallas as pl
from jax.experimental.pallas import tpu as pltpu


def _lstm_kernel(x_ref,      # (T*B, F)  f32, time-major, batch-padded input
                 w_ih_ref,   # (F, 4H)   bf16, gate cols [i, f, o, 2*g]
                 w_hh_ref,   # (H, 4H)   bf16, gate cols [i, f, o, 2*g]
                 b_ref,      # (1, 4H)   f32, b_ih + b_hh, [i, f, o, 2*g]
                 w_lin_ref,  # (1, H)    f32, linear head weight
                 b_lin_ref,  # (1, 1)    f32, linear head bias
                 out_ref,    # (B, 1)    f32, Linear(hn[0]) per padded row
                 *, hidden, batch, seq):
    H, B, T = hidden, batch, seq
    w_hh = w_hh_ref[...]

    # Hoisted input projection: ONE (T*B, F) @ (F, 4H) bf16 MXU pass, kept
    # register-resident (only 8 vregs) -- no VMEM scratch round-trip.
    gx = jnp.dot(x_ref[...].astype(jnp.bfloat16), w_ih_ref[...],
                 preferred_element_type=jnp.float32) + b_ref[...]   # (T*B, 4H) f32

    h = jnp.zeros((B, H), jnp.float32)
    c = jnp.zeros((B, H), jnp.float32)

    # T is small and static -> fully unrolled straight-line recurrence; only
    # h @ W_hh (one bf16 MXU pass) sits on the serial dependency chain.
    for t in range(T):
        gates = gx[t * B:(t + 1) * B, :] + jnp.dot(
            h.astype(jnp.bfloat16), w_hh, preferred_element_type=jnp.float32)
        act = jax.nn.sigmoid(gates)              # one full-vreg EUP launch
        i = act[:, 0 * H:1 * H]
        f = act[:, 1 * H:2 * H]
        o = act[:, 2 * H:3 * H]
        g = 2.0 * act[:, 3 * H:4 * H] - 1.0      # tanh(z) = 2*sigmoid(2z) - 1
        c = f * c + i * g
        h = o * jnp.tanh(c)

    # Fused Linear(H, 1) head: VPU mul + lane reduce (XLU slot), (B,1) store.
    out_ref[...] = (jnp.sum(h * w_lin_ref[...], axis=-1, keepdims=True)
                    + b_lin_ref[...])


def pack_params(params, hidden_units):
    """One-time weight prep (hoisted out of the forward path).

    Layer-0 weights only (layer 1 is dead code for hn[0]).  Gate blocks are
    reordered from PyTorch's [i, f, g, o] to [i, f, o, g], the g block is
    pre-scaled by 2 (so tanh can be recovered from one fused sigmoid), and
    the MXU operands are cast to bf16.
    """
    H = hidden_units

    def reorder(w):                      # w: (4H, in) torch layout -> (in, 4H)
        i, f, g, o = jnp.split(w, 4, axis=0)
        return jnp.concatenate([i, f, o, 2.0 * g], axis=0).T

    b = params["b_ih_l0"] + params["b_hh_l0"]
    bi, bf, bg, bo = jnp.split(b, 4)
    return {
        "w_ih": reorder(params["w_ih_l0"]).astype(jnp.bfloat16),     # (F, 4H)
        "w_hh": reorder(params["w_hh_l0"]).astype(jnp.bfloat16),     # (H, 4H)
        "b": jnp.concatenate([bi, bf, bo, 2.0 * bg])
               .reshape(1, 4 * H).astype(jnp.float32),               # (1, 4H)
        "w_lin": params["w_lin"].reshape(1, H).astype(jnp.float32),  # (1, H)
        "b_lin": params["b_lin"].reshape(1, 1).astype(jnp.float32),  # (1, 1)
    }


def shallow_regression_lstm(x, packed, hidden_units):
    """x: (batch, seq, num_sensors) f32, packed = pack_params(...) -> (batch,)."""
    B, T, F = x.shape
    H = hidden_units
    B_pad = max(8, -(-B // 8) * 8)       # pad batch (sublane dim) to mult of 8

    # Dropout(p=0) is the identity -> no-op.
    x = x.astype(jnp.float32)
    x_p = jnp.pad(x, ((0, B_pad - B), (0, 0), (0, 0)))
    # Time-major + flatten so the kernel slices contiguous (B_pad, F) rows.
    x_tm = jnp.transpose(x_p, (1, 0, 2)).reshape(T * B_pad, F)

    vmem = pl.BlockSpec(memory_space=pltpu.MemorySpace.VMEM)
    out = pl.pallas_call(
        functools.partial(_lstm_kernel, hidden=H, batch=B_pad, seq=T),
        out_shape=jax.ShapeDtypeStruct((B_pad, 1), jnp.float32),
        in_specs=[vmem] * 6,
        out_specs=vmem,
    )(x_tm, packed["w_ih"], packed["w_hh"], packed["b"],
      packed["w_lin"], packed["b_lin"])

    return out[:B, 0]                    # flatten() of Linear(hn[0])


def _reference_forward(x, params, hidden_units):
    """Pure-JAX reference: FULL 2-layer torch.nn.LSTM semantics + Linear head (f32)."""
    H = hidden_units
    B = x.shape[0]

    def cell(x_t, h, c, w_ih, w_hh, b_ih, b_hh):
        g = x_t @ w_ih.T + b_ih + h @ w_hh.T + b_hh
        i = jax.nn.sigmoid(g[:, 0 * H:1 * H])
        f = jax.nn.sigmoid(g[:, 1 * H:2 * H])
        gg = jnp.tanh(g[:, 2 * H:3 * H])
        o = jax.nn.sigmoid(g[:, 3 * H:4 * H])
        c = f * c + i * gg
        h = o * jnp.tanh(c)
        return h, c

    def scan_fn(carry, x_t):
        h0, c0, h1, c1 = carry
        h0, c0 = cell(x_t, h0, c0, params["w_ih_l0"], params["w_hh_l0"],
                      params["b_ih_l0"], params["b_hh_l0"])
        h1, c1 = cell(h0, h1, c1, params["w_ih_l1"], params["w_hh_l1"],
                      params["b_ih_l1"], params["b_hh_l1"])
        return (h0, c0, h1, c1), None

    z = jnp.zeros((B, H), jnp.float32)
    (h0f, _, _, _), _ = lax.scan(scan_fn, (z, z, z, z),
                                 jnp.transpose(x, (1, 0, 2)))
    return (h0f @ params["w_lin"].T + params["b_lin"]).reshape(-1)


def init_params(key, num_sensors, hidden_units):
    """Deterministic PyTorch-style uniform(-1/sqrt(H), 1/sqrt(H)) init."""
    H, F = hidden_units, num_sensors
    k = 1.0 / jnp.sqrt(jnp.float32(H))
    names_shapes = [
        ("w_ih_l0", (4 * H, F)), ("w_hh_l0", (4 * H, H)),
        ("b_ih_l0", (4 * H,)),   ("b_hh_l0", (4 * H,)),
        ("w_ih_l1", (4 * H, H)), ("w_hh_l1", (4 * H, H)),
        ("b_ih_l1", (4 * H,)),   ("b_hh_l1", (4 * H,)),
        ("w_lin",   (1, H)),     ("b_lin",   (1,)),
    ]
    params = {}
    keys = jax.random.split(key, len(names_shapes))
    for (name, shape), sub in zip(names_shapes, keys):
        params[name] = jax.random.uniform(sub, shape, jnp.float32, -k, k)
    return params


if __name__ == "__main__":
    BATCH = 2
    SEQ = 8
    NUM_SENSORS = 4
    HIDDEN = 32

    root = jax.random.PRNGKey(0)
    kx, kp = jax.random.split(root)
    x = jax.random.normal(kx, (BATCH, SEQ, NUM_SENSORS), jnp.float32)
    params = init_params(kp, NUM_SENSORS, HIDDEN)

    # One-time weight prep (kept out of the per-call forward path).
    packed = pack_params(params, HIDDEN)

    fwd = jax.jit(shallow_regression_lstm, static_argnums=2)
    out = jax.block_until_ready(fwd(x, packed, HIDDEN))
    ref = jax.block_until_ready(_reference_forward(x, params, HIDDEN))

    assert out.shape == (BATCH,), out.shape
    # Tolerance relaxed vs the pure-f32 reference because the MXU operands are
    # bf16 (accumulation stays f32); errors are at the ~1e-3 level.
    assert jnp.allclose(out, ref, atol=2e-2, rtol=2e-2), (out, ref)
    print("KERNEL_OK")
</pallas_src>

<mosaic_0001>
module attributes {stable_mosaic.version = 11 : i64} {
  func.func @_lstm_kernel(%arg0: memref<64x4xf32, #tpu.memory_space<vmem>>, %arg1: memref<4x128xbf16, #tpu.memory_space<vmem>>, %arg2: memref<32x128xbf16, #tpu.memory_space<vmem>>, %arg3: memref<1x128xf32, #tpu.memory_space<vmem>>, %arg4: memref<1x32xf32, #tpu.memory_space<vmem>>, %arg5: memref<1x1xf32, #tpu.memory_space<vmem>>, %arg6: memref<8x1xf32, #tpu.memory_space<vmem>>) attributes {dimension_semantics = [], scalar_prefetch = 0 : i64, scratch_operands = 0 : i64, tpu.core_type = #tpu.core_type<tc>} {
    %c0 = arith.constant 0 : index
    %c0_0 = arith.constant 0 : index
    %0 = vector.load %arg2[%c0, %c0_0] : memref<32x128xbf16, #tpu.memory_space<vmem>>, vector<32x128xbf16>
    %c0_1 = arith.constant 0 : index
    %c0_2 = arith.constant 0 : index
    %1 = vector.load %arg0[%c0_1, %c0_2] : memref<64x4xf32, #tpu.memory_space<vmem>>, vector<64x4xf32>
    %2 = arith.truncf %1 : vector<64x4xf32> to vector<64x4xbf16>
    %c0_3 = arith.constant 0 : index
    %c0_4 = arith.constant 0 : index
    %3 = vector.load %arg1[%c0_3, %c0_4] : memref<4x128xbf16, #tpu.memory_space<vmem>>, vector<4x128xbf16>
    %cst = arith.constant dense<0.000000e+00> : vector<64x128xf32>
    %4 = tpu.matmul %2, %3, %cst {dimension_numbers = #tpu.dot_dimension_numbers<[1], [0], [0], [1], [0, 0, 1, 1], [], []>} : vector<64x4xbf16>, vector<4x128xbf16>, vector<64x128xf32> -> vector<64x128xf32>
    %c0_5 = arith.constant 0 : index
    %c0_6 = arith.constant 0 : index
    %5 = vector.load %arg3[%c0_5, %c0_6] : memref<1x128xf32, #tpu.memory_space<vmem>>, vector<1x128xf32>
    %6 = vector.broadcast %5 : vector<1x128xf32> to vector<64x128xf32>
    %7 = arith.addf %4, %6 : vector<64x128xf32>
    %cst_7 = arith.constant 0.000000e+00 : f32
    %8 = vector.broadcast %cst_7 : f32 to vector<8x32xf32>
    %cst_8 = arith.constant 0.000000e+00 : f32
    %9 = vector.broadcast %cst_8 : f32 to vector<8x32xf32>
    %10 = vector.extract_strided_slice %7 {offsets = [0, 0], sizes = [8, 128], strides = [1, 1]} : vector<64x128xf32> to vector<8x128xf32>
    %11 = arith.truncf %8 : vector<8x32xf32> to vector<8x32xbf16>
    %cst_9 = arith.constant dense<0.000000e+00> : vector<8x128xf32>
    %12 = tpu.matmul %11, %0, %cst_9 {dimension_numbers = #tpu.dot_dimension_numbers<[1], [0], [0], [1], [0, 0, 1, 1], [], []>} : vector<8x32xbf16>, vector<32x128xbf16>, vector<8x128xf32> -> vector<8x128xf32>
    %13 = arith.addf %10, %12 : vector<8x128xf32>
    %14 = arith.negf %13 : vector<8x128xf32>
    %15 = math.exp %14 : vector<8x128xf32>
    %cst_10 = arith.constant 1.000000e+00 : f32
    %16 = vector.broadcast %cst_10 : f32 to vector<8x128xf32>
    %17 = arith.addf %16, %15 : vector<8x128xf32>
    %18 = arith.divf %16, %17 : vector<8x128xf32>
    %19 = vector.extract_strided_slice %18 {offsets = [0, 0], sizes = [8, 32], strides = [1, 1]} : vector<8x128xf32> to vector<8x32xf32>
    %20 = vector.extract_strided_slice %18 {offsets = [0, 32], sizes = [8, 32], strides = [1, 1]} : vector<8x128xf32> to vector<8x32xf32>
    %21 = vector.extract_strided_slice %18 {offsets = [0, 64], sizes = [8, 32], strides = [1, 1]} : vector<8x128xf32> to vector<8x32xf32>
    %22 = vector.extract_strided_slice %18 {offsets = [0, 96], sizes = [8, 32], strides = [1, 1]} : vector<8x128xf32> to vector<8x32xf32>
    %cst_11 = arith.constant 2.000000e+00 : f32
    %23 = vector.broadcast %cst_11 : f32 to vector<8x32xf32>
    %24 = arith.mulf %23, %22 : vector<8x32xf32>
    %cst_12 = arith.constant 1.000000e+00 : f32
    %25 = vector.broadcast %cst_12 : f32 to vector<8x32xf32>
    %26 = arith.subf %24, %25 : vector<8x32xf32>
    %27 = arith.mulf %20, %9 : vector<8x32xf32>
    %28 = arith.mulf %19, %26 : vector<8x32xf32>
    %29 = arith.addf %27, %28 : vector<8x32xf32>
    %30 = math.tanh %29 : vector<8x32xf32>
    %31 = arith.mulf %21, %30 : vector<8x32xf32>
    %32 = vector.extract_strided_slice %7 {offsets = [8, 0], sizes = [8, 128], strides = [1, 1]} : vector<64x128xf32> to vector<8x128xf32>
    %33 = arith.truncf %31 : vector<8x32xf32> to vector<8x32xbf16>
    %cst_13 = arith.constant dense<0.000000e+00> : vector<8x128xf32>
    %34 = tpu.matmul %33, %0, %cst_13 {dimension_numbers = #tpu.dot_dimension_numbers<[1], [0], [0], [1], [0, 0, 1, 1], [], []>} : vector<8x32xbf16>, vector<32x128xbf16>, vector<8x128xf32> -> vector<8x128xf32>
    %35 = arith.addf %32, %34 : vector<8x128xf32>
    %36 = arith.negf %35 : vector<8x128xf32>
    %37 = math.exp %36 : vector<8x128xf32>
    %cst_14 = arith.constant 1.000000e+00 : f32
    %38 = vector.broadcast %cst_14 : f32 to vector<8x128xf32>
    %39 = arith.addf %38, %37 : vector<8x128xf32>
    %40 = arith.divf %38, %39 : vector<8x128xf32>
    %41 = vector.extract_strided_slice %40 {offsets = [0, 0], sizes = [8, 32], strides = [1, 1]} : vector<8x128xf32> to vector<8x32xf32>
    %42 = vector.extract_strided_slice %40 {offsets = [0, 32], sizes = [8, 32], strides = [1, 1]} : vector<8x128xf32> to vector<8x32xf32>
    %43 = vector.extract_strided_slice %40 {offsets = [0, 64], sizes = [8, 32], strides = [1, 1]} : vector<8x128xf32> to vector<8x32xf32>
    %44 = vector.extract_strided_slice %40 {offsets = [0, 96], sizes = [8, 32], strides = [1, 1]} : vector<8x128xf32> to vector<8x32xf32>
    %cst_15 = arith.constant 2.000000e+00 : f32
    %45 = vector.broadcast %cst_15 : f32 to vector<8x32xf32>
    %46 = arith.mulf %45, %44 : vector<8x32xf32>
    %cst_16 = arith.constant 1.000000e+00 : f32
    %47 = vector.broadcast %cst_16 : f32 to vector<8x32xf32>
    %48 = arith.subf %46, %47 : vector<8x32xf32>
    %49 = arith.mulf %42, %29 : vector<8x32xf32>
    %50 = arith.mulf %41, %48 : vector<8x32xf32>
    %51 = arith.addf %49, %50 : vector<8x32xf32>
    %52 = math.tanh %51 : vector<8x32xf32>
    %53 = arith.mulf %43, %52 : vector<8x32xf32>
    %54 = vector.extract_strided_slice %7 {offsets = [16, 0], sizes = [8, 128], strides = [1, 1]} : vector<64x128xf32> to vector<8x128xf32>
    %55 = arith.truncf %53 : vector<8x32xf32> to vector<8x32xbf16>
    %cst_17 = arith.constant dense<0.000000e+00> : vector<8x128xf32>
    %56 = tpu.matmul %55, %0, %cst_17 {dimension_numbers = #tpu.dot_dimension_numbers<[1], [0], [0], [1], [0, 0, 1, 1], [], []>} : vector<8x32xbf16>, vector<32x128xbf16>, vector<8x128xf32> -> vector<8x128xf32>
    %57 = arith.addf %54, %56 : vector<8x128xf32>
    %58 = arith.negf %57 : vector<8x128xf32>
    %59 = math.exp %58 : vector<8x128xf32>
    %cst_18 = arith.constant 1.000000e+00 : f32
    %60 = vector.broadcast %cst_18 : f32 to vector<8x128xf32>
    %61 = arith.addf %60, %59 : vector<8x128xf32>
    %62 = arith.divf %60, %61 : vector<8x128xf32>
    %63 = vector.extract_strided_slice %62 {offsets = [0, 0], sizes = [8, 32], strides = [1, 1]} : vector<8x128xf32> to vector<8x32xf32>
    %64 = vector.extract_strided_slice %62 {offsets = [0, 32], sizes = [8, 32], strides = [1, 1]} : vector<8x128xf32> to vector<8x32xf32>
    %65 = vector.extract_strided_slice %62 {offsets = [0, 64], sizes = [8, 32], strides = [1, 1]} : vector<8x128xf32> to vector<8x32xf32>
    %66 = vector.extract_strided_slice %62 {offsets = [0, 96], sizes = [8, 32], strides = [1, 1]} : vector<8x128xf32> to vector<8x32xf32>
    %cst_19 = arith.constant 2.000000e+00 : f32
    %67 = vector.broadcast %cst_19 : f32 to vector<8x32xf32>
    %68 = arith.mulf %67, %66 : vector<8x32xf32>
    %cst_20 = arith.constant 1.000000e+00 : f32
    %69 = vector.broadcast %cst_20 : f32 to vector<8x32xf32>
    %70 = arith.subf %68, %69 : vector<8x32xf32>
    %71 = arith.mulf %64, %51 : vector<8x32xf32>
    %72 = arith.mulf %63, %70 : vector<8x32xf32>
    %73 = arith.addf %71, %72 : vector<8x32xf32>
    %74 = math.tanh %73 : vector<8x32xf32>
    %75 = arith.mulf %65, %74 : vector<8x32xf32>
    %76 = vector.extract_strided_slice %7 {offsets = [24, 0], sizes = [8, 128], strides = [1, 1]} : vector<64x128xf32> to vector<8x128xf32>
    %77 = arith.truncf %75 : vector<8x32xf32> to vector<8x32xbf16>
    %cst_21 = arith.constant dense<0.000000e+00> : vector<8x128xf32>
    %78 = tpu.matmul %77, %0, %cst_21 {dimension_numbers = #tpu.dot_dimension_numbers<[1], [0], [0], [1], [0, 0, 1, 1], [], []>} : vector<8x32xbf16>, vector<32x128xbf16>, vector<8x128xf32> -> vector<8x128xf32>
    %79 = arith.addf %76, %78 : vector<8x128xf32>
    %80 = arith.negf %79 : vector<8x128xf32>
    %81 = math.exp %80 : vector<8x128xf32>
    %cst_22 = arith.constant 1.000000e+00 : f32
    %82 = vector.broadcast %cst_22 : f32 to vector<8x128xf32>
    %83 = arith.addf %82, %81 : vector<8x128xf32>
    %84 = arith.divf %82, %83 : vector<8x128xf32>
    %85 = vector.extract_strided_slice %84 {offsets = [0, 0], sizes = [8, 32], strides = [1, 1]} : vector<8x128xf32> to vector<8x32xf32>
    %86 = vector.extract_strided_slice %84 {offsets = [0, 32], sizes = [8, 32], strides = [1, 1]} : vector<8x128xf32> to vector<8x32xf32>
    %87 = vector.extract_strided_slice %84 {offsets = [0, 64], sizes = [8, 32], strides = [1, 1]} : vector<8x128xf32> to vector<8x32xf32>
    %88 = vector.extract_strided_slice %84 {offsets = [0, 96], sizes = [8, 32], strides = [1, 1]} : vector<8x128xf32> to vector<8x32xf32>
    %cst_23 = arith.constant 2.000000e+00 : f32
    %89 = vector.broadcast %cst_23 : f32 to vector<8x32xf32>
    %90 = arith.mulf %89, %88 : vector<8x32xf32>
    %cst_24 = arith.constant 1.000000e+00 : f32
    %91 = vector.broadcast %cst_24 : f32 to vector<8x32xf32>
    %92 = arith.subf %90, %91 : vector<8x32xf32>
    %93 = arith.mulf %86, %73 : vector<8x32xf32>
    %94 = arith.mulf %85, %92 : vector<8x32xf32>
    %95 = arith.addf %93, %94 : vector<8x32xf32>
    %96 = math.tanh %95 : vector<8x32xf32>
    %97 = arith.mulf %87, %96 : vector<8x32xf32>
    %98 = vector.extract_strided_slice %7 {offsets = [32, 0], sizes = [8, 128], strides = [1, 1]} : vector<64x128xf32> to vector<8x128xf32>
    %99 = arith.truncf %97 : vector<8x32xf32> to vector<8x32xbf16>
    %cst_25 = arith.constant dense<0.000000e+00> : vector<8x128xf32>
    %100 = tpu.matmul %99, %0, %cst_25 {dimension_numbers = #tpu.dot_dimension_numbers<[1], [0], [0], [1], [0, 0, 1, 1], [], []>} : vector<8x32xbf16>, vector<32x128xbf16>, vector<8x128xf32> -> vector<8x128xf32>
    %101 = arith.addf %98, %100 : vector<8x128xf32>
    %102 = arith.negf %101 : vector<8x128xf32>
    %103 = math.exp %102 : vector<8x128xf32>
    %cst_26 = arith.constant 1.000000e+00 : f32
    %104 = vector.broadcast %cst_26 : f32 to vector<8x128xf32>
    %105 = arith.addf %104, %103 : vector<8x128xf32>
    %106 = arith.divf %104, %105 : vector<8x128xf32>
    %107 = vector.extract_strided_slice %106 {offsets = [0, 0], sizes = [8, 32], strides = [1, 1]} : vector<8x128xf32> to vector<8x32xf32>
    %108 = vector.extract_strided_slice %106 {offsets = [0, 32], sizes = [8, 32], strides = [1, 1]} : vector<8x128xf32> to vector<8x32xf32>
    %109 = vector.extract_strided_slice %106 {offsets = [0, 64], sizes = [8, 32], strides = [1, 1]} : vector<8x128xf32> to vector<8x32xf32>
    %110 = vector.extract_strided_slice %106 {offsets = [0, 96], sizes = [8, 32], strides = [1, 1]} : vector<8x128xf32> to vector<8x32xf32>
    %cst_27 = arith.constant 2.000000e+00 : f32
    %111 = vector.broadcast %cst_27 : f32 to vector<8x32xf32>
    %112 = arith.mulf %111, %110 : vector<8x32xf32>
    %cst_28 = arith.constant 1.000000e+00 : f32
    %113 = vector.broadcast %cst_28 : f32 to vector<8x32xf32>
    %114 = arith.subf %112, %113 : vector<8x32xf32>
    %115 = arith.mulf %108, %95 : vector<8x32xf32>
    %116 = arith.mulf %107, %114 : vector<8x32xf32>
    %117 = arith.addf %115, %116 : vector<8x32xf32>
    %118 = math.tanh %117 : vector<8x32xf32>
    %119 = arith.mulf %109, %118 : vector<8x32xf32>
    %120 = vector.extract_strided_slice %7 {offsets = [40, 0], sizes = [8, 128], strides = [1, 1]} : vector<64x128xf32> to vector<8x128xf32>
    %121 = arith.truncf %119 : vector<8x32xf32> to vector<8x32xbf16>
    %cst_29 = arith.constant dense<0.000000e+00> : vector<8x128xf32>
    %122 = tpu.matmul %121, %0, %cst_29 {dimension_numbers = #tpu.dot_dimension_numbers<[1], [0], [0], [1], [0, 0, 1, 1], [], []>} : vector<8x32xbf16>, vector<32x128xbf16>, vector<8x128xf32> -> vector<8x128xf32>
    %123 = arith.addf %120, %122 : vector<8x128xf32>
    %124 = arith.negf %123 : vector<8x128xf32>
    %125 = math.exp %124 : vector<8x128xf32>
    %cst_30 = arith.constant 1.000000e+00 : f32
    %126 = vector.broadcast %cst_30 : f32 to vector<8x128xf32>
    %127 = arith.addf %126, %125 : vector<8x128xf32>
    %128 = arith.divf %126, %127 : vector<8x128xf32>
    %129 = vector.extract_strided_slice %128 {offsets = [0, 0], sizes = [8, 32], strides = [1, 1]} : vector<8x128xf32> to vector<8x32xf32>
    %130 = vector.extract_strided_slice %128 {offsets = [0, 32], sizes = [8, 32], strides = [1, 1]} : vector<8x128xf32> to vector<8x32xf32>
    %131 = vector.extract_strided_slice %128 {offsets = [0, 64], sizes = [8, 32], strides = [1, 1]} : vector<8x128xf32> to vector<8x32xf32>
    %132 = vector.extract_strided_slice %128 {offsets = [0, 96], sizes = [8, 32], strides = [1, 1]} : vector<8x128xf32> to vector<8x32xf32>
    %cst_31 = arith.constant 2.000000e+00 : f32
    %133 = vector.broadcast %cst_31 : f32 to vector<8x32xf32>
    %134 = arith.mulf %133, %132 : vector<8x32xf32>
    %cst_32 = arith.constant 1.000000e+00 : f32
    %135 = vector.broadcast %cst_32 : f32 to vector<8x32xf32>
    %136 = arith.subf %134, %135 : vector<8x32xf32>
    %137 = arith.mulf %130, %117 : vector<8x32xf32>
    %138 = arith.mulf %129, %136 : vector<8x32xf32>
    %139 = arith.addf %137, %138 : vector<8x32xf32>
    %140 = math.tanh %139 : vector<8x32xf32>
    %141 = arith.mulf %131, %140 : vector<8x32xf32>
    %142 = vector.extract_strided_slice %7 {offsets = [48, 0], sizes = [8, 128], strides = [1, 1]} : vector<64x128xf32> to vector<8x128xf32>
    %143 = arith.truncf %141 : vector<8x32xf32> to vector<8x32xbf16>
    %cst_33 = arith.constant dense<0.000000e+00> : vector<8x128xf32>
    %144 = tpu.matmul %143, %0, %cst_33 {dimension_numbers = #tpu.dot_dimension_numbers<[1], [0], [0], [1], [0, 0, 1, 1], [], []>} : vector<8x32xbf16>, vector<32x128xbf16>, vector<8x128xf32> -> vector<8x128xf32>
    %145 = arith.addf %142, %144 : vector<8x128xf32>
    %146 = arith.negf %145 : vector<8x128xf32>
    %147 = math.exp %146 : vector<8x128xf32>
    %cst_34 = arith.constant 1.000000e+00 : f32
    %148 = vector.broadcast %cst_34 : f32 to vector<8x128xf32>
    %149 = arith.addf %148, %147 : vector<8x128xf32>
    %150 = arith.divf %148, %149 : vector<8x128xf32>
    %151 = vector.extract_strided_slice %150 {offsets = [0, 0], sizes = [8, 32], strides = [1, 1]} : vector<8x128xf32> to vector<8x32xf32>
    %152 = vector.extract_strided_slice %150 {offsets = [0, 32], sizes = [8, 32], strides = [1, 1]} : vector<8x128xf32> to vector<8x32xf32>
    %153 = vector.extract_strided_slice %150 {offsets = [0, 64], sizes = [8, 32], strides = [1, 1]} : vector<8x128xf32> to vector<8x32xf32>
    %154 = vector.extract_strided_slice %150 {offsets = [0, 96], sizes = [8, 32], strides = [1, 1]} : vector<8x128xf32> to vector<8x32xf32>
    %cst_35 = arith.constant 2.000000e+00 : f32
    %155 = vector.broadcast %cst_35 : f32 to vector<8x32xf32>
    %156 = arith.mulf %155, %154 : vector<8x32xf32>
    %cst_36 = arith.constant 1.000000e+00 : f32
    %157 = vector.broadcast %cst_36 : f32 to vector<8x32xf32>
    %158 = arith.subf %156, %157 : vector<8x32xf32>
    %159 = arith.mulf %152, %139 : vector<8x32xf32>
    %160 = arith.mulf %151, %158 : vector<8x32xf32>
    %161 = arith.addf %159, %160 : vector<8x32xf32>
    %162 = math.tanh %161 : vector<8x32xf32>
    %163 = arith.mulf %153, %162 : vector<8x32xf32>
    %164 = vector.extract_strided_slice %7 {offsets = [56, 0], sizes = [8, 128], strides = [1, 1]} : vector<64x128xf32> to vector<8x128xf32>
    %165 = arith.truncf %163 : vector<8x32xf32> to vector<8x32xbf16>
    %cst_37 = arith.constant dense<0.000000e+00> : vector<8x128xf32>
    %166 = tpu.matmul %165, %0, %cst_37 {dimension_numbers = #tpu.dot_dimension_numbers<[1], [0], [0], [1], [0, 0, 1, 1], [], []>} : vector<8x32xbf16>, vector<32x128xbf16>, vector<8x128xf32> -> vector<8x128xf32>
    %167 = arith.addf %164, %166 : vector<8x128xf32>
    %168 = arith.negf %167 : vector<8x128xf32>
    %169 = math.exp %168 : vector<8x128xf32>
    %cst_38 = arith.constant 1.000000e+00 : f32
    %170 = vector.broadcast %cst_38 : f32 to vector<8x128xf32>
    %171 = arith.addf %170, %169 : vector<8x128xf32>
    %172 = arith.divf %170, %171 : vector<8x128xf32>
    %173 = vector.extract_strided_slice %172 {offsets = [0, 0], sizes = [8, 32], strides = [1, 1]} : vector<8x128xf32> to vector<8x32xf32>
    %174 = vector.extract_strided_slice %172 {offsets = [0, 32], sizes = [8, 32], strides = [1, 1]} : vector<8x128xf32> to vector<8x32xf32>
    %175 = vector.extract_strided_slice %172 {offsets = [0, 64], sizes = [8, 32], strides = [1, 1]} : vector<8x128xf32> to vector<8x32xf32>
    %176 = vector.extract_strided_slice %172 {offsets = [0, 96], sizes = [8, 32], strides = [1, 1]} : vector<8x128xf32> to vector<8x32xf32>
    %cst_39 = arith.constant 2.000000e+00 : f32
    %177 = vector.broadcast %cst_39 : f32 to vector<8x32xf32>
    %178 = arith.mulf %177, %176 : vector<8x32xf32>
    %cst_40 = arith.constant 1.000000e+00 : f32
    %179 = vector.broadcast %cst_40 : f32 to vector<8x32xf32>
    %180 = arith.subf %178, %179 : vector<8x32xf32>
    %181 = arith.mulf %174, %161 : vector<8x32xf32>
    %182 = arith.mulf %173, %180 : vector<8x32xf32>
    %183 = arith.addf %181, %182 : vector<8x32xf32>
    %184 = math.tanh %183 : vector<8x32xf32>
    %185 = arith.mulf %175, %184 : vector<8x32xf32>
    %c0_41 = arith.constant 0 : index
    %c0_42 = arith.constant 0 : index
    %186 = vector.load %arg4[%c0_41, %c0_42] : memref<1x32xf32, #tpu.memory_space<vmem>>, vector<1x32xf32>
    %187 = vector.broadcast %186 : vector<1x32xf32> to vector<8x32xf32>
    %188 = arith.mulf %185, %187 : vector<8x32xf32>
    %cst_43 = arith.constant dense<0.000000e+00> : vector<8xf32>
    %189 = vector.multi_reduction <add>, %188, %cst_43 [1] : vector<8x32xf32> to vector<8xf32>
    %190 = vector.shape_cast %189 : vector<8xf32> to vector<8x1xf32>
    %c0_44 = arith.constant 0 : index
    %c0_45 = arith.constant 0 : index
    %191 = vector.load %arg5[%c0_44, %c0_45] : memref<1x1xf32, #tpu.memory_space<vmem>>, vector<1x1xf32>
    %192 = vector.broadcast %191 : vector<1x1xf32> to vector<8x1xf32>
    %193 = arith.addf %190, %192 : vector<8x1xf32>
    %c0_46 = arith.constant 0 : index
    %c0_47 = arith.constant 0 : index
    %194 = vector.load %arg6[%c0_46, %c0_47] : memref<8x1xf32, #tpu.memory_space<vmem>>, vector<8x1xf32>
    tpu.vector_store %arg6[%c0_46, %c0_47], %193 {strides = array<i32>} : memref<8x1xf32, #tpu.memory_space<vmem>>, vector<8x1xf32>,
    return
  }
}

</mosaic_0001>

<bundles_post_ra>
// kernel: shallow_regression_lstm.1
= control target key start
LH: loop header
LB: loop body
LE: loop exit
PB: predicated region body
PF: predicated region fallthrough
CT: control target
= control target key end

     0   :  { %vm63_vm0 = vcmask 1041408   ;;  %v947_v1 = vmov 0.0   ;;  %vm948_vm1 = vmmov 0   ;;  %vm50_vm2 = vcmask 31744   ;;  %s951_s11 = smov 64   ;;  %s1157_s1 = inlined_call_operand.vmem [shape: bf16[4,128], index: 1, kind: input, shape index: {}]   ;;  %s1158_s2 = inlined_call_operand.vmem [shape: bf16[32,128], index: 2, kind: input, shape index: {}]   ;;  %s1159_s0 = inlined_call_operand.vmem [shape: f32[64,4], index: 0, kind: input, shape index: {}]   ;;  %s1160_s3 = inlined_call_operand.vmem [shape: f32[1,128], index: 3, kind: input, shape index: {}]   ;;  %s1161_s4 = inlined_call_operand.vmem [shape: f32[1,32], index: 4, kind: input, shape index: {}]   ;;  %s1162_s5 = inlined_call_operand.<no memory space> [shape: f32[1,1], index: 5, kind: input, shape index: {}]   ;;  %s1163_s6 = inlined_call_operand.vmem [shape: f32[8,1], index: 6, kind: output, shape index: {}]  }
   0x1   :  { %v42_v0 = vld [vmem:[%s1157_s1] sm:$0x3]  ;;  %827 = vmatprep.subr.bf16.mxu1 %v947_v1  ;;  %831 = vmatprep.mubr.msk.bf16.mxu1 %vm948_vm1, %v947_v1  ;;  %v31_v5 = vld [vmem:[%s1159_s0 + $0x8] sm:$0xff]  ;;  %v32_v7 = vld [vmem:[%s1159_s0 + $0x10] sm:$0xff]  ;;  %v949_v11 = vmov 0   ;;  %vm144_vm3 = vcmask 261120  }
   0x2   :  { %891 = vmatprep.subr.msk.bf16.mxu0 %vm63_vm0, %v42_v0  ;;  %v65_v2 = vsel %vm63_vm0, %v42_v0, 0  ;;  %v996_v3 = vld [vmem:[%s1158_s2] sm:$0xff]   ;;  %v33_v8 = vld [vmem:[%s1159_s0 + $0x18] sm:$0xff]  ;;  %v1014_v10 = vld [vmem:[%s1158_s2 + $0x8] sm:$0xff]   ;;  %vm750_vm4 = vcmask 7168  }
   0x3   :  { %v30_v4 = vld [vmem:[%s1159_s0] sm:$0xff]  ;;  %818 = vmatpush3.bf16.msra.mxu0 %v65_v2  ;;  %828 = vmatpush3.bf16.msra.mxu1 %v996_v3  ;;  %v39_v9 = vpack.c.bf16 %v33_v8, %v32_v7  ;;  %v35_v57 = vld [vmem:[%s1159_s0 + $0x28] sm:$0xff]  ;;  %v36_v58 = vld [vmem:[%s1159_s0 + $0x30] sm:$0xff] }
   0x4   :  { %v38_v6 = vpack.c.bf16 %v31_v5, %v30_v4  ;;  %843 = vmatprep.subr.bf16.mxu0 %v947_v1  ;;  %829 = vmatprep.subr.bf16.mxu1 %v947_v1  ;;  %v1035_v12 = vld [vmem:[%s1160_s3] ss:$0 sm:$0xff]  ;;  %s950_s3 = smov 32   ;;  %v37_v60 = vld [vmem:[%s1159_s0 + $0x38] sm:$0xff] }
   0x5   :  { %v34_v56 = vld [vmem:[%s1159_s0 + $0x20] sm:$0xff]  ;;  %v41_v61 = vpack.c.bf16 %v37_v60, %v36_v58 }
   0x6   :  { %819 = vmatprep.mubr.msk.bf16.mxu0 %vm50_vm2, %v38_v6  ;;  %v40_v59 = vpack.c.bf16 %v35_v57, %v34_v56 }
   0x7   :  { %820 = vmatmul.mubr.msk.bf16.vlgmr.msra.gmra.mrb[0].mxu0 %vm50_vm2, %v39_v9  ;;  %830 = vmatpush3.bf16.msra.mxu1 %v1014_v10 }
   0x8   :  { %844 = vmatpush3.bf16.msra.mxu0 %v996_v3  ;;  %835 = vmatprep.subr.bf16.mxu1 %v947_v1 }
   0x9   :  { %845 = vmatprep.subr.bf16.mxu0 %v947_v1  ;;  %823 = vmatprep.mubr.msk.bf16.mxu0 %vm50_vm2, %v40_v59 }
   0xa   :  { %832 = vmatmul.mubr.bf16.vlgmr.msra.gmra.mrb[0].mxu1 %v949_v11 }
   0xb   :  { %836 = vmatpush3.bf16.msra.mxu1 %v996_v3  ;;  %839 = vmatprep.mubr.msk.bf16.mxu1 %vm948_vm1, %v947_v1 }
   0xc   :  { %846 = vmatpush3.bf16.msra.mxu0 %v1014_v10  ;;  %837 = vmatprep.subr.bf16.mxu1 %v947_v1 }
   0xd   :  { %859 = vmatprep.subr.bf16.mxu0 %v947_v1 }
   0xf   :  { %838 = vmatpush3.bf16.msra.mxu1 %v1014_v10  ;;  %824 = vmatmul.mubr.msk.bf16.gmra.mrb[4].mxu0 %vm50_vm2, %v41_v61 }
  0x10   :  { %851 = vmatprep.subr.bf16.mxu1 %v947_v1  ;;  %847 = vmatprep.mubr.msk.bf16.mxu0 %vm948_vm1, %v947_v1 }
  0xda   :  { %v1037_v13 = vpop.f32.mrb[0].mxu0 }
  0xdb   :  { %v101_v14 = vpop.f32.mrb[1].mxu0  ;;  %v110_v9 = vadd.f32 %v1037_v13, %v1035_v12 }
  0xdc   :  { %v102_v15 = vadd.f32 %v1035_v12, %v101_v14  ;;  %v1040_v16 = vpop.f32.mrb[2].mxu0 }
  0xdd   :  { %v104_v17 = vpop.f32.mrb[3].mxu0  ;;  %v182_v18 = vpop.f32.mrb[0].mxu1 }
  0xde   :  { %v188_v19 = vadd.f32 %v182_v18, %v102_v15  ;;  %v833_v20 = vpop.f32.mrb[1].mxu1  ;;  %v105_v39 = vadd.f32 %v1035_v12, %v104_v17 }
  0xdf   :  { %v185_v21 = vpop.f32.mrb[2].mxu1 }
  0xe0   :  { %v763_v22 = vmul.f32 -1.442695, %v188_v19  ;;  %v834_v23 = vpop.f32.mrb[3].mxu1 }
  0xe2   :  { %899 = vpow2.f32 %v763_v22  ;;  %v1074_v4 = vpop.f32.mrb[4].mxu0 }
  0xe3   :  { %v1076_v5 = vpop.f32.mrb[5].mxu0 }
  0xe4   :  { %v1078_v6 = vpop.f32.mrb[6].mxu0 }
  0xe5   :  { %v1080_v7 = vpop.f32.mrb[7].mxu0 }
  0xec   :  { %v900_v24 = vpop.eup %899 }
  0xed   :  { %v192_v25 = vadd.f32 1.0, %v900_v24 }
  0xef   :  { %901 = vrcp.f32 %v192_v25 }
  0xf9   :  { %v902_v26 = vpop.eup %901 }
  0xfa   :  { %v195_v27 = vmul.f32 2.0, %v902_v26  ;;  %v197_v31 = vmul.f32 0.0, %v902_v26 }
  0xfc   :  { %v764_v28 = vadd.f32 -1.0, %v195_v27 }
  0xfe   :  { %199 = vrot.lane.b32.xlu0 %v764_v28, %s950_s3 }
 0x170   :  { %v200_v29 = vpop.permute.xlu0 %199 }
 0x171   :  { %v202_v30 = vmul.f32 %v902_v26, %v200_v29 }
 0x173   :  { %204 = vrot.lane.b32.xlu0 %v202_v30, %s950_s3 }
 0x1e5   :  { %v205_v32 = vpop.permute.xlu0 %204 }
 0x1e6   :  { %v207_v33 = vadd.f32 %v205_v32, %v197_v31 }
 0x1e8   :  { %903 = vtanh.f32 %v207_v33 }
 0x1f2   :  { %v904_v34 = vpop.eup %903 }
 0x1f3   :  { %210 = vrot.lane.b32.xlu1 %v904_v34, %s950_s3  ;;  %v113_v34 = vadd.f32 %v1040_v16, %v1035_v12 }
 0x265   :  { %v211_v35 = vpop.permute.xlu1 %210 }
 0x266   :  { %v213_v36 = vmul.f32 %v902_v26, %v211_v35 }
 0x268   :  { %v214_v37 = vpack.c.bf16 %v213_v36, %v213_v36 }
 0x26a   :  { %216 = vrot.lane.b32.xlu1 %v214_v37, %s951_s11 }
 0x2dc   :  { %v217_v38 = vpop.permute.xlu1 %216 }
 0x2dd   :  { %840 = vmatmul.mubr.msk.bf16.vlgmr.msra.gmra.mrb[4].mxu1 %vm144_vm3, %v217_v38 }
 0x2de   :  { %852 = vmatpush3.bf16.msra.mxu1 %v996_v3  ;;  %855 = vmatprep.mubr.msk.bf16.mxu1 %vm948_vm1, %v947_v1 }
 0x2df   :  { %853 = vmatprep.subr.bf16.mxu1 %v947_v1 }
 0x2e2   :  { %854 = vmatpush3.bf16.msra.mxu1 %v1014_v10 }
 0x2e3   :  { %867 = vmatprep.subr.bf16.mxu1 %v947_v1 }
 0x3b0   :  { %v255_v40 = vpop.f32.mrb[4].mxu1 }
 0x3b1   :  { %v261_v41 = vadd.f32 %v255_v40, %v105_v39  ;;  %v841_v42 = vpop.f32.mrb[5].mxu1 }
 0x3b2   :  { %v258_v43 = vpop.f32.mrb[6].mxu1 }
 0x3b3   :  { %v766_v44 = vmul.f32 -1.442695, %v261_v41  ;;  %v842_v45 = vpop.f32.mrb[7].mxu1 }
 0x3b5   :  { %905 = vpow2.f32 %v766_v44 }
 0x3bf   :  { %v906_v46 = vpop.eup %905 }
 0x3c0   :  { %v265_v47 = vadd.f32 1.0, %v906_v46 }
 0x3c2   :  { %907 = vrcp.f32 %v265_v47 }
 0x3cc   :  { %v908_v48 = vpop.eup %907 }
 0x3cd   :  { %v268_v49 = vmul.f32 2.0, %v908_v48  ;;  %v270_v53 = vmul.f32 %v908_v48, %v207_v33 }
 0x3cf   :  { %v767_v50 = vadd.f32 -1.0, %v268_v49 }
 0x3d1   :  { %272 = vrot.lane.b32.xlu0 %v767_v50, %s950_s3 }
 0x443   :  { %v273_v51 = vpop.permute.xlu0 %272 }
 0x444   :  { %v275_v52 = vmul.f32 %v908_v48, %v273_v51 }
 0x446   :  { %277 = vrot.lane.b32.xlu1 %v275_v52, %s950_s3 }
 0x4b8   :  { %v278_v54 = vpop.permute.xlu1 %277 }
 0x4b9   :  { %v280_v55 = vadd.f32 %v278_v54, %v270_v53 }
 0x4bb   :  { %909 = vtanh.f32 %v280_v55 }
 0x4c5   :  { %v910_v62 = vpop.eup %909 }
 0x4c6   :  { %283 = vrot.lane.b32.xlu0 %v910_v62, %s950_s3 }
 0x538   :  { %v284_v63 = vpop.permute.xlu0 %283 }
 0x539   :  { %v286_v0 = vmul.f32 %v908_v48, %v284_v63 }
 0x53b   :  { %v287_v2 = vpack.c.bf16 %v286_v0, %v286_v0 }
 0x53d   :  { %289 = vrot.lane.b32.xlu1 %v287_v2, %s951_s11 }
 0x5af   :  { %v290_v8 = vpop.permute.xlu1 %289 }
 0x5b0   :  { %848 = vmatmul.mubr.msk.bf16.vlgmr.msra.gmra.mrb[8].mxu0 %vm144_vm3, %v290_v8 }
 0x5b1   :  { %860 = vmatpush3.bf16.msra.mxu0 %v996_v3  ;;  %863 = vmatprep.mubr.msk.bf16.mxu0 %vm948_vm1, %v947_v1 }
 0x5b2   :  { %861 = vmatprep.subr.bf16.mxu0 %v947_v1 }
 0x5b5   :  { %862 = vmatpush3.bf16.msra.mxu0 %v1014_v10 }
 0x5b6   :  { %875 = vmatprep.subr.bf16.mxu0 %v947_v1 }
 0x683   :  { %v328_v11 = vpop.f32.mrb[8].mxu0 }
 0x684   :  { %v334_v14 = vadd.f32 %v328_v11, %v110_v9  ;;  %v849_v15 = vpop.f32.mrb[9].mxu0 }
 0x685   :  { %v331_v17 = vpop.f32.mrb[10].mxu0 }
 0x686   :  { %v769_v18 = vmul.f32 -1.442695, %v334_v14  ;;  %v850_v19 = vpop.f32.mrb[11].mxu0 }
 0x688   :  { %911 = vpow2.f32 %v769_v18 }
 0x692   :  { %v912_v20 = vpop.eup %911 }
 0x693   :  { %v338_v21 = vadd.f32 1.0, %v912_v20 }
 0x695   :  { %913 = vrcp.f32 %v338_v21 }
 0x69f   :  { %v914_v22 = vpop.eup %913 }
 0x6a0   :  { %v341_v23 = vmul.f32 2.0, %v914_v22  ;;  %v343_v13 = vmul.f32 %v914_v22, %v280_v55  ;;  %v118_v55 = vadd.f32 %v1035_v12, %v1076_v5 }
 0x6a2   :  { %v770_v24 = vadd.f32 -1.0, %v341_v23 }
 0x6a4   :  { %345 = vrot.lane.b32.xlu0 %v770_v24, %s950_s3 }
 0x716   :  { %v346_v25 = vpop.permute.xlu0 %345 }
 0x717   :  { %v348_v26 = vmul.f32 %v914_v22, %v346_v25 }
 0x719   :  { %350 = vrot.lane.b32.xlu1 %v348_v26, %s950_s3 }
 0x78b   :  { %v351_v27 = vpop.permute.xlu1 %350 }
 0x78c   :  { %v353_v28 = vadd.f32 %v351_v27, %v343_v13 }
 0x78e   :  { %915 = vtanh.f32 %v353_v28 }
 0x798   :  { %v916_v29 = vpop.eup %915 }
 0x799   :  { %356 = vrot.lane.b32.xlu0 %v916_v29, %s950_s3 }
 0x80b   :  { %v357_v30 = vpop.permute.xlu0 %356 }
 0x80c   :  { %v359_v31 = vmul.f32 %v914_v22, %v357_v30  ;;  %v121_v22 = vadd.f32 %v1035_v12, %v1080_v7 }
 0x80e   :  { %v360_v32 = vpack.c.bf16 %v359_v31, %v359_v31 }
 0x810   :  { %362 = vrot.lane.b32.xlu1 %v360_v32, %s951_s11 }
 0x882   :  { %v363_v33 = vpop.permute.xlu1 %362 }
 0x883   :  { %856 = vmatmul.mubr.msk.bf16.vlgmr.msra.gmra.mrb[8].mxu1 %vm144_vm3, %v363_v33 }
 0x884   :  { %868 = vmatpush3.bf16.msra.mxu1 %v996_v3  ;;  %871 = vmatprep.mubr.msk.bf16.mxu1 %vm948_vm1, %v947_v1 }
 0x885   :  { %869 = vmatprep.subr.bf16.mxu1 %v947_v1 }
 0x888   :  { %870 = vmatpush3.bf16.msra.mxu1 %v1014_v10 }
 0x889   :  { %883 = vmatprep.subr.bf16.mxu1 %v947_v1 }
 0x956   :  { %v401_v35 = vpop.f32.mrb[8].mxu1 }
 0x957   :  { %v407_v36 = vadd.f32 %v401_v35, %v113_v34  ;;  %v857_v37 = vpop.f32.mrb[9].mxu1 }
 0x958   :  { %v404_v38 = vpop.f32.mrb[10].mxu1 }
 0x959   :  { %v772_v39 = vmul.f32 -1.442695, %v407_v36  ;;  %v858_v40 = vpop.f32.mrb[11].mxu1 }
 0x95b   :  { %917 = vpow2.f32 %v772_v39  ;;  %v126_v39 = vadd.f32 %v1074_v4, %v1035_v12 }
 0x965   :  { %v918_v41 = vpop.eup %917 }
 0x966   :  { %v411_v42 = vadd.f32 1.0, %v918_v41 }
 0x968   :  { %919 = vrcp.f32 %v411_v42 }
 0x972   :  { %v920_v43 = vpop.eup %919 }
 0x973   :  { %v414_v44 = vmul.f32 2.0, %v920_v43  ;;  %v416_v16 = vmul.f32 %v920_v43, %v353_v28 }
 0x975   :  { %v773_v45 = vadd.f32 -1.0, %v414_v44 }
 0x977   :  { %418 = vrot.lane.b32.xlu0 %v773_v45, %s950_s3 }
 0x9e9   :  { %v419_v46 = vpop.permute.xlu0 %418 }
 0x9ea   :  { %v421_v47 = vmul.f32 %v920_v43, %v419_v46 }
 0x9ec   :  { %423 = vrot.lane.b32.xlu1 %v421_v47, %s950_s3 }
 0xa5e   :  { %v424_v48 = vpop.permute.xlu1 %423 }
 0xa5f   :  { %v426_v49 = vadd.f32 %v424_v48, %v416_v16 }
 0xa61   :  { %921 = vtanh.f32 %v426_v49 }
 0xa6b   :  { %v922_v50 = vpop.eup %921 }
 0xa6c   :  { %429 = vrot.lane.b32.xlu0 %v922_v50, %s950_s3 }
 0xade   :  { %v430_v51 = vpop.permute.xlu0 %429 }
 0xadf   :  { %v432_v52 = vmul.f32 %v920_v43, %v430_v51 }
 0xae1   :  { %v433_v53 = vpack.c.bf16 %v432_v52, %v432_v52 }
 0xae3   :  { %435 = vrot.lane.b32.xlu1 %v433_v53, %s951_s11 }
 0xb55   :  { %v436_v54 = vpop.permute.xlu1 %435 }
 0xb56   :  { %864 = vmatmul.mubr.msk.bf16.vlgmr.msra.gmra.mrb[12].mxu0 %vm144_vm3, %v436_v54 }
 0xb57   :  { %876 = vmatpush3.bf16.msra.mxu0 %v996_v3  ;;  %879 = vmatprep.mubr.msk.bf16.mxu0 %vm948_vm1, %v947_v1 }
 0xb58   :  { %877 = vmatprep.subr.bf16.mxu0 %v947_v1 }
 0xb5b   :  { %878 = vmatpush3.bf16.msra.mxu0 %v1014_v10 }
 0xc29   :  { %v474_v56 = vpop.f32.mrb[12].mxu0 }
 0xc2a   :  { %v480_v57 = vadd.f32 %v474_v56, %v118_v55  ;;  %v865_v58 = vpop.f32.mrb[13].mxu0 }
 0xc2b   :  { %v477_v59 = vpop.f32.mrb[14].mxu0 }
 0xc2c   :  { %v775_v60 = vmul.f32 -1.442695, %v480_v57  ;;  %v866_v61 = vpop.f32.mrb[15].mxu0  ;;  %v129_v59 = vadd.f32 %v1078_v6, %v1035_v12  ;;  %v786_v12 = vld [vmem:[%s1161_s4] ss:$0 sm:$0xff] }
 0xc2e   :  { %923 = vpow2.f32 %v775_v60 }
 0xc38   :  { %v924_v62 = vpop.eup %923 }
 0xc39   :  { %v484_v63 = vadd.f32 1.0, %v924_v62 }
 0xc3b   :  { %925 = vrcp.f32 %v484_v63 }
 0xc45   :  { %v926_v0 = vpop.eup %925 }
 0xc46   :  { %v487_v2 = vmul.f32 2.0, %v926_v0  ;;  %v489_v5 = vmul.f32 %v926_v0, %v426_v49 }
 0xc48   :  { %v776_v8 = vadd.f32 -1.0, %v487_v2 }
 0xc4a   :  { %491 = vrot.lane.b32.xlu0 %v776_v8, %s950_s3 }
 0xcbc   :  { %v492_v9 = vpop.permute.xlu0 %491 }
 0xcbd   :  { %v494_v11 = vmul.f32 %v926_v0, %v492_v9 }
 0xcbf   :  { %496 = vrot.lane.b32.xlu1 %v494_v11, %s950_s3 }
 0xd31   :  { %v497_v14 = vpop.permute.xlu1 %496 }
 0xd32   :  { %v499_v15 = vadd.f32 %v497_v14, %v489_v5 }
 0xd34   :  { %927 = vtanh.f32 %v499_v15 }
 0xd3e   :  { %v928_v17 = vpop.eup %927 }
 0xd3f   :  { %502 = vrot.lane.b32.xlu0 %v928_v17, %s950_s3 }
 0xdb1   :  { %v503_v18 = vpop.permute.xlu0 %502 }
 0xdb2   :  { %v505_v19 = vmul.f32 %v926_v0, %v503_v18 }
 0xdb4   :  { %v506_v20 = vpack.c.bf16 %v505_v19, %v505_v19 }
 0xdb6   :  { %508 = vrot.lane.b32.xlu1 %v506_v20, %s951_s11 }
 0xe28   :  { %v509_v21 = vpop.permute.xlu1 %508 }
 0xe29   :  { %872 = vmatmul.mubr.msk.bf16.vlgmr.msra.gmra.mrb[12].mxu1 %vm144_vm3, %v509_v21  ;;  %v11_v21 = vstv %s1162_s5 }
 0xe2a   :  { %884 = vmatpush3.bf16.msra.mxu1 %v996_v3  ;;  %887 = vmatprep.mubr.msk.bf16.mxu1 %vm948_vm1, %v947_v1  ;;  %12 = vst [vmem:[#allocation2] sm:$0x1] %v11_v21 }
 0xe2b   :  { %885 = vmatprep.subr.bf16.mxu1 %v947_v1 }
 0xe2e   :  { %886 = vmatpush3.bf16.msra.mxu1 %v1014_v10 }
 0xefc   :  { %v547_v23 = vpop.f32.mrb[12].mxu1 }
 0xefd   :  { %v553_v24 = vadd.f32 %v547_v23, %v121_v22  ;;  %v873_v25 = vpop.f32.mrb[13].mxu1 }
 0xefe   :  { %v550_v26 = vpop.f32.mrb[14].mxu1 }
 0xeff   :  { %v778_v13 = vmul.f32 -1.442695, %v553_v24  ;;  %v874_v27 = vpop.f32.mrb[15].mxu1 }
 0xf00   :  { %v787_v27 = vld [vmem:[#allocation2] ss:$0 sm:$0xff] }
 0xf01   :  { %929 = vpow2.f32 %v778_v13 }
 0xf0b   :  { %v930_v28 = vpop.eup %929 }
 0xf0c   :  { %v557_v29 = vadd.f32 1.0, %v930_v28 }
 0xf0e   :  { %931 = vrcp.f32 %v557_v29 }
 0xf18   :  { %v932_v3 = vpop.eup %931 }
 0xf19   :  { %v560_v30 = vmul.f32 2.0, %v932_v3  ;;  %v562_v7 = vmul.f32 %v932_v3, %v499_v15 }
 0xf1b   :  { %v779_v31 = vadd.f32 -1.0, %v560_v30 }
 0xf1d   :  { %564 = vrot.lane.b32.xlu0 %v779_v31, %s950_s3 }
 0xf8f   :  { %v565_v1 = vpop.permute.xlu0 %564 }
 0xf90   :  { %v567_v10 = vmul.f32 %v932_v3, %v565_v1 }
 0xf92   :  { %569 = vrot.lane.b32.xlu1 %v567_v10, %s950_s3 }
0x1004   :  { %v570_v32 = vpop.permute.xlu1 %569 }
0x1005   :  { %v572_v33 = vadd.f32 %v570_v32, %v562_v7 }
0x1007   :  { %933 = vtanh.f32 %v572_v33 }
0x1011   :  { %v934_v34 = vpop.eup %933 }
0x1012   :  { %575 = vrot.lane.b32.xlu0 %v934_v34, %s950_s3 }
0x1084   :  { %v576_v35 = vpop.permute.xlu0 %575 }
0x1085   :  { %v578_v36 = vmul.f32 %v932_v3, %v576_v35 }
0x1087   :  { %v579_v37 = vpack.c.bf16 %v578_v36, %v578_v36 }
0x1089   :  { %581 = vrot.lane.b32.xlu1 %v579_v37, %s951_s11 }
0x10fb   :  { %v582_v38 = vpop.permute.xlu1 %581 }
0x10fc   :  { %880 = vmatmul.mubr.msk.bf16.vlgmr.msra.gmra.mrb[16].mxu0 %vm144_vm3, %v582_v38 }
0x11cf   :  { %v620_v40 = vpop.f32.mrb[16].mxu0 }
0x11d0   :  { %v626_v41 = vadd.f32 %v620_v40, %v126_v39  ;;  %v881_v42 = vpop.f32.mrb[17].mxu0 }
0x11d1   :  { %v623_v43 = vpop.f32.mrb[18].mxu0 }
0x11d2   :  { %v781_v44 = vmul.f32 -1.442695, %v626_v41  ;;  %v882_v45 = vpop.f32.mrb[19].mxu0 }
0x11d4   :  { %935 = vpow2.f32 %v781_v44 }
0x11de   :  { %v936_v46 = vpop.eup %935 }
0x11df   :  { %v630_v47 = vadd.f32 1.0, %v936_v46 }
0x11e1   :  { %937 = vrcp.f32 %v630_v47 }
0x11eb   :  { %v938_v16 = vpop.eup %937 }
0x11ec   :  { %v633_v48 = vmul.f32 2.0, %v938_v16  ;;  %v635_v4 = vmul.f32 %v938_v16, %v572_v33 }
0x11ee   :  { %v782_v49 = vadd.f32 -1.0, %v633_v48 }
0x11f0   :  { %637 = vrot.lane.b32.xlu0 %v782_v49, %s950_s3 }
0x1262   :  { %v638_v50 = vpop.permute.xlu0 %637 }
0x1263   :  { %v640_v51 = vmul.f32 %v938_v16, %v638_v50 }
0x1265   :  { %642 = vrot.lane.b32.xlu1 %v640_v51, %s950_s3 }
0x12d7   :  { %v643_v52 = vpop.permute.xlu1 %642 }
0x12d8   :  { %v645_v53 = vadd.f32 %v643_v52, %v635_v4 }
0x12da   :  { %939 = vtanh.f32 %v645_v53 }
0x12e4   :  { %v940_v54 = vpop.eup %939 }
0x12e5   :  { %648 = vrot.lane.b32.xlu0 %v940_v54, %s950_s3 }
0x1357   :  { %v649_v55 = vpop.permute.xlu0 %648 }
0x1358   :  { %v651_v56 = vmul.f32 %v938_v16, %v649_v55 }
0x135a   :  { %v652_v57 = vpack.c.bf16 %v651_v56, %v651_v56 }
0x135c   :  { %654 = vrot.lane.b32.xlu1 %v652_v57, %s951_s11 }
0x13ce   :  { %v655_v58 = vpop.permute.xlu1 %654 }
0x13cf   :  { %888 = vmatmul.mubr.msk.bf16.vlgmr.msra.gmra.mrb[16].mxu1 %vm144_vm3, %v655_v58 }
0x14a2   :  { %v693_v60 = vpop.f32.mrb[16].mxu1 }
0x14a3   :  { %v699_v61 = vadd.f32 %v693_v60, %v129_v59  ;;  %v889_v62 = vpop.f32.mrb[17].mxu1 }
0x14a4   :  { %v696_v63 = vpop.f32.mrb[18].mxu1 }
0x14a5   :  { %v784_v0 = vmul.f32 -1.442695, %v699_v61  ;;  %v890_v2 = vpop.f32.mrb[19].mxu1 }
0x14a7   :  { %941 = vpow2.f32 %v784_v0 }
0x14b1   :  { %v942_v8 = vpop.eup %941 }
0x14b2   :  { %v703_v9 = vadd.f32 1.0, %v942_v8 }
0x14b4   :  { %943 = vrcp.f32 %v703_v9 }
0x14be   :  { %v944_v11 = vpop.eup %943 }
0x14bf   :  { %v706_v5 = vmul.f32 2.0, %v944_v11  ;;  %v708_v6 = vmul.f32 %v944_v11, %v645_v53 }
0x14c1   :  { %v785_v14 = vadd.f32 -1.0, %v706_v5 }
0x14c3   :  { %710 = vrot.lane.b32.xlu0 %v785_v14, %s950_s3 }
0x1535   :  { %v711_v15 = vpop.permute.xlu0 %710 }
0x1536   :  { %v713_v17 = vmul.f32 %v944_v11, %v711_v15 }
0x1538   :  { %715 = vrot.lane.b32.xlu1 %v713_v17, %s950_s3 }
0x153c   :  { %731 = vrot.lane.b32.xlu1 %v786_v12, %s951_s11 }
0x15aa   :  { %v716_v18 = vpop.permute.xlu1 %715 }
0x15ab   :  { %v718_v19 = vadd.f32 %v716_v18, %v708_v6 }
0x15ad   :  { %945 = vtanh.f32 %v718_v19 }
0x15ae   :  { %v732_v23 = vpop.permute.xlu1 %731 }
0x15b7   :  { %v946_v20 = vpop.eup %945 }
0x15b8   :  { %721 = vrot.lane.b32.xlu0 %v946_v20, %s950_s3 }
0x162a   :  { %v722_v22 = vpop.permute.xlu0 %721 }
0x162b   :  { %v724_v24 = vmul.f32 %v944_v11, %v722_v22 }
0x162d   :  { %v734_v25 = vmul.f32 %v732_v23, %v724_v24 }
0x162f   :  { %736 = vrot.lane.b32.xlu0 %v734_v25, %s951_s11 }
0x16a1   :  { %v737_v26 = vpop.permute.xlu0 %736 }
0x16a2   :  { %v739_v13 = vsel %vm144_vm3, %v737_v26, 0.0 }
0x16a3   :  { %740 = vadd.xlane.f32.xlu1 %v739_v13 }
0x1730   :  { %v741_v28 = vpop.xlane.xlu1 %740 }
0x1731   :  { %v749_v29 = vadd.f32 %v787_v27, %v741_v28 }
0x1733   :  { %751 = vst.msk [vmem:[%s1163_s6] sm:$0xff] %vm750_vm4, %v749_v29 }

</bundles_post_ra>
